<compile_context>
chip_gen: v6e
topology: v6e:2x2x1
jax: 0.10.0
libtpu: 0.0.40
codegen_flags: <defaults>
</compile_context>

<pallas_src>
import functools

import jax
import jax.numpy as jnp
from jax import lax
from jax.experimental import pallas as pl
from jax.experimental.pallas import tpu as pltpu


# ------------------------------ Pallas kernels ---------------------------------
def _conv_stats_kernel(p_ref, w_ref, conv_ref, stats_ref):
    """Pass 1: one (batch, row-tile) grid step.

    p_ref    : (1, K, TM)   bf16  im2col patches, K = Cin*KH*KW, TM = TH*OW (lane axis)
    w_ref    : (Cp, K)      bf16  folded weights, channels on sublanes (resident)
    conv_ref : (1, Cp, TM)  bf16  pre-BN conv activations (channels on sublanes)
    stats_ref: (1, Cp, 2)   f32   per-batch [sum, sum-of-squares], accumulated across row tiles
    """
    # Single MXU contraction: (Cp, K) @ (K, TM) -> (Cp, TM), f32 accumulation.
    acc = jnp.dot(w_ref[...], p_ref[0], preferred_element_type=jnp.float32)
    conv_ref[0] = acc.astype(conv_ref.dtype)          # bf16 intermediate store

    # BN partial sums accumulated in the VMEM-resident per-batch stats block.
    @pl.when(pl.program_id(1) == 0)
    def _():
        stats_ref[...] = jnp.zeros_like(stats_ref)

    s1 = jnp.sum(acc, axis=1, keepdims=True)           # (Cp, 1)
    s2 = jnp.sum(acc * acc, axis=1, keepdims=True)     # (Cp, 1)
    stats_ref[0] += jnp.concatenate([s1, s2], axis=1)  # (Cp, 2)


def _bn_relu_kernel(conv_ref, scale_ref, shift_ref, o_ref, *, neg_slope):
    """Pass 2: y = conv * scale + shift, then ReLU (neg_slope=0) or LeakyReLU(0.1).

    conv_ref : (1, Cp, TM) bf16 ; scale/shift : (Cp, 1) f32 ; o_ref : (1, Cp, TM) f32
    """
    y = conv_ref[0].astype(jnp.float32) * scale_ref[...] + shift_ref[...]
    o_ref[0] = jnp.where(y > 0, y, neg_slope * y).astype(o_ref.dtype)


# ------------------------------- padding glue -----------------------------------
def _same_pad_1d(in_, k, s, d=1):
    """Mirror SamePadConv2d.get_pad_odd."""
    eff = (k - 1) * d + 1
    out = (in_ + s - 1) // s
    padding = max(0, (out - 1) * s + eff - in_)
    odd = padding % 2
    return padding, odd, out


def _resolve_padding(H, W, KH, KW, stride, padding):
    sh, sw = stride
    if padding == 'SAME':
        pr_total, r_odd, OH = _same_pad_1d(H, KH, sh)
        pc_total, c_odd, OW = _same_pad_1d(W, KW, sw)
        # SamePadConv2d: F.pad adds the odd pixel on bottom/right, conv pads total//2 per side.
        pt, pb = pr_total // 2, pr_total // 2 + r_odd
        pL, pR = pc_total // 2, pc_total // 2 + c_odd
    else:
        p = int(padding)
        pt = pb = pL = pR = p
        OH = (H + 2 * p - KH) // sh + 1
        OW = (W + 2 * p - KW) // sw + 1
    return (pt, pb, pL, pR), (OH, OW)


# ----------------------------- tiling / VMEM sizing -------------------------------
def _vmem_capacity_bytes():
    """Generation-aware VMEM capacity (v7x: 64 MiB, v5e/v6e: 128 MiB)."""
    try:
        cap = int(getattr(pltpu.get_tpu_info(), "vmem_capacity_bytes", 0))
        if cap > 0:
            return cap
    except Exception:
        pass
    return 64 * 1024 * 1024   # conservative default


def _choose_row_tile(OH, OW, K, Cp, bytes_budget):
    """Largest output-row tile TH (divisor of OH) whose per-step buffers fit the budget.

    Legality: TH*OW must be a multiple of 128 (lane-dense blocks) or TH == OH
    (block equals the full flattened-spatial dim).
    """
    divisors = [t for t in range(OH, 0, -1) if OH % t == 0]
    legal = [t for t in divisors if (t * OW) % 128 == 0 or t == OH]

    def per_step(t):
        m = t * OW
        return (2 * (K * m * 2)        # patches, double-buffered, bf16
                + 2 * (Cp * m * 2)     # conv intermediate, double-buffered, bf16
                + 2 * (Cp * m * 4)     # final f32 output (pass 2), double-buffered
                + K * Cp * 2           # resident weights
                + Cp * 2 * 4)          # resident stats accumulator

    for t in legal:
        if per_step(t) <= bytes_budget:
            return t
    return legal[-1]


# --------------------------------- wrapper ---------------------------------------
def conv_bn_relu_forward(x_nchw, w_oihw, bias, gamma, beta,
                         *, stride=1, padding=0, eps=1e-5, leaky=False):
    # The conv bias is cancelled exactly by training-mode BatchNorm (it shifts the
    # activations and their batch mean identically), so skip it.
    del bias

    stride = (stride, stride) if isinstance(stride, int) else tuple(stride)
    sh, sw = stride
    N, Cin, H, W = x_nchw.shape
    Cout, _, KH, KW = w_oihw.shape
    (pt, pb, pL, pR), (OH, OW) = _resolve_padding(H, W, KH, KW, stride, padding)
    OHW = OH * OW
    K = Cin * KH * KW
    # Channels live on sublanes -> pad Cout only to a multiple of 8 (not 128).
    Cp = -(-Cout // 8) * 8

    # ---- wrapper-side im2col: lane-dense (flattened spatial on lanes) patches ------
    x_pad = jnp.pad(x_nchw, ((0, 0), (0, 0), (pt, pb), (pL, pR))).astype(jnp.bfloat16)
    slabs = []
    for kh in range(KH):
        for kw in range(KW):
            slabs.append(x_pad[:, :,
                               kh:kh + (OH - 1) * sh + 1:sh,
                               kw:kw + (OW - 1) * sw + 1:sw])        # (N, Cin, OH, OW)
    # K ordered (ci, kh, kw) to match w_oihw.reshape(Cout, Cin*KH*KW).
    patches = jnp.stack(slabs, axis=2).reshape(N, K, OHW)            # bf16

    w_mat = w_oihw.reshape(Cout, K)
    w_mat = jnp.pad(w_mat, ((0, Cp - Cout), (0, 0))).astype(jnp.bfloat16)   # (Cp, K)

    # ---- generation-aware tile sizing ---------------------------------------------
    vmem_cap = _vmem_capacity_bytes()
    TH = _choose_row_tile(OH, OW, K, Cp, int(0.30 * vmem_cap))
    TM = TH * OW
    n_h = OH // TH
    vmem_limit = int(0.70 * vmem_cap)

    cparams_p1 = pltpu.CompilerParams(
        dimension_semantics=("parallel", "arbitrary"),   # stats accumulate across row tiles
        vmem_limit_bytes=vmem_limit)
    cparams_p2 = pltpu.CompilerParams(
        dimension_semantics=("parallel", "parallel"),
        vmem_limit_bytes=vmem_limit)

    # ---- pass 1: conv (single MXU contraction) + per-batch BN partial sums ---------
    conv_out, stats = pl.pallas_call(
        _conv_stats_kernel,
        grid=(N, n_h),
        in_specs=[
            pl.BlockSpec((1, K, TM), lambda n, h: (n, 0, h)),
            pl.BlockSpec((Cp, K), lambda n, h: (0, 0)),          # resident weights
        ],
        out_specs=(
            pl.BlockSpec((1, Cp, TM), lambda n, h: (n, 0, h)),
            pl.BlockSpec((1, Cp, 2), lambda n, h: (n, 0, 0)),    # per-batch accumulator
        ),
        out_shape=(
            jax.ShapeDtypeStruct((N, Cp, OHW), jnp.bfloat16),    # bf16 intermediate
            jax.ShapeDtypeStruct((N, Cp, 2), jnp.float32),
        ),
        compiler_params=cparams_p1,
    )(patches, w_mat)

    # ---- tiny glue: finalize global batch stats -> per-channel affine --------------
    count = float(N * OHW)
    tot = jnp.sum(stats, axis=0)                                  # (Cp, 2)
    mean = tot[:, 0] / count
    var = jnp.maximum(tot[:, 1] / count - mean * mean, 0.0)       # one-pass variance
    inv = lax.rsqrt(var + eps)
    g = jnp.pad(gamma.astype(jnp.float32), (0, Cp - Cout))
    b = jnp.pad(beta.astype(jnp.float32), (0, Cp - Cout))
    scale = (g * inv).reshape(Cp, 1)
    shift = (b - mean * g * inv).reshape(Cp, 1)

    # ---- pass 2: normalize + (leaky) ReLU, written directly in NCHW-flat layout ----
    y = pl.pallas_call(
        functools.partial(_bn_relu_kernel, neg_slope=0.1 if leaky else 0.0),
        grid=(N, n_h),
        in_specs=[
            pl.BlockSpec((1, Cp, TM), lambda n, h: (n, 0, h)),
            pl.BlockSpec((Cp, 1), lambda n, h: (0, 0)),           # resident scale
            pl.BlockSpec((Cp, 1), lambda n, h: (0, 0)),           # resident shift
        ],
        out_specs=pl.BlockSpec((1, Cp, TM), lambda n, h: (n, 0, h)),
        out_shape=jax.ShapeDtypeStruct((N, Cp, OHW), jnp.float32),
        compiler_params=cparams_p2,
    )(conv_out, scale, shift)

    # Free reshape to NCHW; channel slice is a no-op when Cout is a multiple of 8.
    out = y.reshape(N, Cp, OH, OW)
    if Cp != Cout:
        out = out[:, :Cout]
    return out


# ----------------------------- pure-JAX reference --------------------------------
def _reference(x_nchw, w_oihw, bias, gamma, beta, *, stride, padding, eps, leaky):
    stride = (stride, stride) if isinstance(stride, int) else tuple(stride)
    N, Cin, H, W = x_nchw.shape
    Cout, _, KH, KW = w_oihw.shape
    (pt, pb, pL, pR), _ = _resolve_padding(H, W, KH, KW, stride, padding)
    # Mirror the kernel's bf16 MXU-input quantization so the comparison isolates the
    # structure (conv + training-mode BN + ReLU); the kernel additionally stores the
    # conv intermediate in bf16, which the looser tolerance below accounts for.
    xq = x_nchw.astype(jnp.bfloat16).astype(jnp.float32)
    wq = w_oihw.astype(jnp.bfloat16).astype(jnp.float32)
    y = lax.conv_general_dilated(
        xq, wq, window_strides=stride, padding=((pt, pb), (pL, pR)),
        dimension_numbers=('NCHW', 'OIHW', 'NCHW'))
    y = y + bias.reshape(1, Cout, 1, 1)   # cancelled by training-mode BN below
    mean = jnp.mean(y, axis=(0, 2, 3), keepdims=True)
    var = jnp.mean((y - mean) ** 2, axis=(0, 2, 3), keepdims=True)
    y = (y - mean) * lax.rsqrt(var + eps)
    y = y * gamma.reshape(1, Cout, 1, 1) + beta.reshape(1, Cout, 1, 1)
    slope = 0.1 if leaky else 0.0
    return jnp.where(y > 0, y, slope * y)


# ------------------------------------ main ----------------------------------------
if __name__ == "__main__":
    key = jax.random.PRNGKey(0)
    k_x, k_w, k_b = jax.random.split(key, 3)

    # Conv_bn_relu(in_planes=4, planes=8, kernel_size=3, stride=1, padding='SAME')
    N, Cin, H, W = 2, 4, 16, 16
    Cout, KH, KW = 8, 3, 3
    stride, padding, leaky = 1, 'SAME', False

    x = jax.random.normal(k_x, (N, Cin, H, W), dtype=jnp.float32)
    fan_in = Cin * KH * KW
    bound = 1.0 / (fan_in ** 0.5)
    w = jax.random.uniform(k_w, (Cout, Cin, KH, KW), minval=-bound, maxval=bound,
                           dtype=jnp.float32)
    b = jax.random.uniform(k_b, (Cout,), minval=-bound, maxval=bound, dtype=jnp.float32)
    gamma = jnp.ones((Cout,), jnp.float32)   # BatchNorm2d default weight
    beta = jnp.zeros((Cout,), jnp.float32)   # BatchNorm2d default bias

    fwd = jax.jit(functools.partial(conv_bn_relu_forward,
                                    stride=stride, padding=padding, leaky=leaky))
    out = jax.block_until_ready(fwd(x, w, b, gamma, beta))

    ref = _reference(x, w, b, gamma, beta, stride=stride, padding=padding,
                     eps=1e-5, leaky=leaky)
    assert out.shape == (N, Cout, H, W), out.shape
    err = float(jnp.max(jnp.abs(out - ref)))
    # Tolerance covers the bf16 conv intermediate (post-BN amplification by 1/std).
    assert err < 2e-2, err
    print("KERNEL_OK")
</pallas_src>

<mosaic_0001>
module attributes {stable_mosaic.version = 11 : i64} {
  func.func @_conv_stats_kernel(%arg0: i32, %arg1: i32, %arg2: memref<1x36x256xbf16, #tpu.memory_space<vmem>>, %arg3: memref<8x36xbf16, #tpu.memory_space<vmem>>, %arg4: memref<1x8x256xbf16, #tpu.memory_space<vmem>>, %arg5: memref<1x8x2xf32, #tpu.memory_space<vmem>>) attributes {dimension_semantics = [#tpu.dimension_semantics<parallel>, #tpu.dimension_semantics<arbitrary>], iteration_bounds = array<i64: 2, 1>, scalar_prefetch = 0 : i64, scratch_operands = 0 : i64, tpu.core_type = #tpu.core_type<tc>, window_params = [{transform_indices = @transform_0, window_bounds = array<i64: 1, 36, 256>}, {pipeline_mode = #tpu.pipeline_mode<synchronous>, transform_indices = @transform_1, window_bounds = array<i64: 8, 36>}, {transform_indices = @transform_2, window_bounds = array<i64: 1, 8, 256>}, {transform_indices = @transform_3, window_bounds = array<i64: 1, 8, 2>}]} {
    %c0 = arith.constant 0 : index
    %c0_0 = arith.constant 0 : index
    %0 = vector.load %arg3[%c0, %c0_0] : memref<8x36xbf16, #tpu.memory_space<vmem>>, vector<8x36xbf16>
    %c0_1 = arith.constant 0 : index
    %c0_2 = arith.constant 0 : index
    %c0_3 = arith.constant 0 : index
    %1 = vector.load %arg2[%c0_1, %c0_2, %c0_3] : memref<1x36x256xbf16, #tpu.memory_space<vmem>>, vector<1x36x256xbf16>
    %2 = vector.shape_cast %1 : vector<1x36x256xbf16> to vector<36x256xbf16>
    %cst = arith.constant dense<0.000000e+00> : vector<8x256xf32>
    %3 = tpu.matmul %0, %2, %cst {dimension_numbers = #tpu.dot_dimension_numbers<[1], [0], [0], [1], [0, 0, 1, 1], [], []>} : vector<8x36xbf16>, vector<36x256xbf16>, vector<8x256xf32> -> vector<8x256xf32>
    %4 = arith.truncf %3 : vector<8x256xf32> to vector<8x256xbf16>
    %c0_4 = arith.constant 0 : index
    %c0_5 = arith.constant 0 : index
    %c0_6 = arith.constant 0 : index
    %5 = vector.load %arg4[%c0_4, %c0_5, %c0_6] : memref<1x8x256xbf16, #tpu.memory_space<vmem>>, vector<1x8x256xbf16>
    %6 = vector.shape_cast %5 : vector<1x8x256xbf16> to vector<8x256xbf16>
    %7 = vector.shape_cast %4 : vector<8x256xbf16> to vector<1x8x256xbf16>
    tpu.vector_store %arg4[%c0_4, %c0_5, %c0_6], %7 {strides = array<i32>} : memref<1x8x256xbf16, #tpu.memory_space<vmem>>, vector<1x8x256xbf16>,
    %c0_i32 = arith.constant 0 : i32
    %8 = arith.cmpi eq, %arg1, %c0_i32 : i32
    %9 = arith.extui %8 : i1 to i32
    %c0_i32_7 = arith.constant 0 : i32
    %10 = arith.cmpi ne, %9, %c0_i32_7 : i32
    scf.if %10 {
      %cst_16 = arith.constant 0.000000e+00 : f32
      %23 = vector.broadcast %cst_16 : f32 to vector<1x8x2xf32>
      %c0_17 = arith.constant 0 : index
      %c0_18 = arith.constant 0 : index
      %c0_19 = arith.constant 0 : index
      %24 = vector.load %arg5[%c0_17, %c0_18, %c0_19] : memref<1x8x2xf32, #tpu.memory_space<vmem>>, vector<1x8x2xf32>
      tpu.vector_store %arg5[%c0_17, %c0_18, %c0_19], %23 {strides = array<i32>} : memref<1x8x2xf32, #tpu.memory_space<vmem>>, vector<1x8x2xf32>,
    } else {
    }
    %cst_8 = arith.constant dense<0.000000e+00> : vector<8xf32>
    %11 = vector.multi_reduction <add>, %3, %cst_8 [1] : vector<8x256xf32> to vector<8xf32>
    %12 = vector.shape_cast %11 : vector<8xf32> to vector<8x1xf32>
    %13 = arith.mulf %3, %3 : vector<8x256xf32>
    %cst_9 = arith.constant dense<0.000000e+00> : vector<8xf32>
    %14 = vector.multi_reduction <add>, %13, %cst_9 [1] : vector<8x256xf32> to vector<8xf32>
    %15 = vector.shape_cast %14 : vector<8xf32> to vector<8x1xf32>
    %c0_10 = arith.constant 0 : index
    %c0_11 = arith.constant 0 : index
    %c0_12 = arith.constant 0 : index
    %16 = vector.load %arg5[%c0_10, %c0_11, %c0_12] : memref<1x8x2xf32, #tpu.memory_space<vmem>>, vector<1x8x2xf32>
    %17 = vector.shape_cast %16 : vector<1x8x2xf32> to vector<8x2xf32>
    %18 = tpu.concatenate %12, %15 in 1 : vector<8x1xf32>, vector<8x1xf32> -> vector<8x2xf32>
    %19 = arith.addf %17, %18 : vector<8x2xf32>
    %c0_13 = arith.constant 0 : index
    %c0_14 = arith.constant 0 : index
    %c0_15 = arith.constant 0 : index
    %20 = vector.load %arg5[%c0_13, %c0_14, %c0_15] : memref<1x8x2xf32, #tpu.memory_space<vmem>>, vector<1x8x2xf32>
    %21 = vector.shape_cast %20 : vector<1x8x2xf32> to vector<8x2xf32>
    %22 = vector.shape_cast %19 : vector<8x2xf32> to vector<1x8x2xf32>
    tpu.vector_store %arg5[%c0_13, %c0_14, %c0_15], %22 {strides = array<i32>} : memref<1x8x2xf32, #tpu.memory_space<vmem>>, vector<1x8x2xf32>,
    return
  }
  func.func @transform_0(%arg0: i32, %arg1: i32) -> (i32, i32, i32) {
    %c0_i32 = arith.constant 0 : i32
    %c0_i32_0 = arith.constant 0 : i32
    return %arg0, %c0_i32, %arg1 : i32, i32, i32
  }
  func.func @transform_1(%arg0: i32, %arg1: i32) -> (i32, i32) {
    %c0_i32 = arith.constant 0 : i32
    %c0_i32_0 = arith.constant 0 : i32
    %c0_i32_1 = arith.constant 0 : i32
    return %c0_i32, %c0_i32_0 : i32, i32
  }
  func.func @transform_2(%arg0: i32, %arg1: i32) -> (i32, i32, i32) {
    %c0_i32 = arith.constant 0 : i32
    %c0_i32_0 = arith.constant 0 : i32
    return %arg0, %c0_i32, %arg1 : i32, i32, i32
  }
  func.func @transform_3(%arg0: i32, %arg1: i32) -> (i32, i32, i32) {
    %c0_i32 = arith.constant 0 : i32
    %c0_i32_0 = arith.constant 0 : i32
    %c0_i32_1 = arith.constant 0 : i32
    return %arg0, %c0_i32, %c0_i32_0 : i32, i32, i32
  }
}

module attributes {stable_mosaic.version = 11 : i64} {
  func.func @_bn_relu_kernel(%arg0: i32, %arg1: i32, %arg2: memref<1x8x256xbf16, #tpu.memory_space<vmem>>, %arg3: memref<8x1xf32, #tpu.memory_space<vmem>>, %arg4: memref<8x1xf32, #tpu.memory_space<vmem>>, %arg5: memref<1x8x256xf32, #tpu.memory_space<vmem>>) attributes {dimension_semantics = [#tpu.dimension_semantics<parallel>, #tpu.dimension_semantics<parallel>], iteration_bounds = array<i64: 2, 1>, scalar_prefetch = 0 : i64, scratch_operands = 0 : i64, tpu.core_type = #tpu.core_type<tc>, window_params = [{transform_indices = @transform_0, window_bounds = array<i64: 1, 8, 256>}, {pipeline_mode = #tpu.pipeline_mode<synchronous>, transform_indices = @transform_1, window_bounds = array<i64: 8, 1>}, {pipeline_mode = #tpu.pipeline_mode<synchronous>, transform_indices = @transform_2, window_bounds = array<i64: 8, 1>}, {transform_indices = @transform_3, window_bounds = array<i64: 1, 8, 256>}]} {
    %c0 = arith.constant 0 : index
    %c0_0 = arith.constant 0 : index
    %c0_1 = arith.constant 0 : index
    %0 = vector.load %arg2[%c0, %c0_0, %c0_1] : memref<1x8x256xbf16, #tpu.memory_space<vmem>>, vector<1x8x256xbf16>
    %1 = vector.shape_cast %0 : vector<1x8x256xbf16> to vector<8x256xbf16>
    %2 = arith.extf %1 : vector<8x256xbf16> to vector<8x256xf32>
    %c0_2 = arith.constant 0 : index
    %c0_3 = arith.constant 0 : index
    %3 = vector.load %arg3[%c0_2, %c0_3] : memref<8x1xf32, #tpu.memory_space<vmem>>, vector<8x1xf32>
    %4 = vector.broadcast %3 : vector<8x1xf32> to vector<8x256xf32>
    %5 = arith.mulf %2, %4 : vector<8x256xf32>
    %c0_4 = arith.constant 0 : index
    %c0_5 = arith.constant 0 : index
    %6 = vector.load %arg4[%c0_4, %c0_5] : memref<8x1xf32, #tpu.memory_space<vmem>>, vector<8x1xf32>
    %7 = vector.broadcast %6 : vector<8x1xf32> to vector<8x256xf32>
    %8 = arith.addf %5, %7 : vector<8x256xf32>
    %cst = arith.constant 0.000000e+00 : f32
    %9 = vector.broadcast %cst : f32 to vector<8x256xf32>
    %10 = arith.cmpf ogt, %8, %9 : vector<8x256xf32>
    %cst_6 = arith.constant 0.000000e+00 : f32
    %11 = vector.broadcast %cst_6 : f32 to vector<8x256xf32>
    %12 = arith.mulf %11, %8 : vector<8x256xf32>
    %13 = arith.select %10, %8, %12 : vector<8x256xi1>, vector<8x256xf32>
    %c0_7 = arith.constant 0 : index
    %c0_8 = arith.constant 0 : index
    %c0_9 = arith.constant 0 : index
    %14 = vector.load %arg5[%c0_7, %c0_8, %c0_9] : memref<1x8x256xf32, #tpu.memory_space<vmem>>, vector<1x8x256xf32>
    %15 = vector.shape_cast %14 : vector<1x8x256xf32> to vector<8x256xf32>
    %16 = vector.shape_cast %13 : vector<8x256xf32> to vector<1x8x256xf32>
    tpu.vector_store %arg5[%c0_7, %c0_8, %c0_9], %16 {strides = array<i32>} : memref<1x8x256xf32, #tpu.memory_space<vmem>>, vector<1x8x256xf32>,
    return
  }
  func.func @transform_0(%arg0: i32, %arg1: i32) -> (i32, i32, i32) {
    %c0_i32 = arith.constant 0 : i32
    %c0_i32_0 = arith.constant 0 : i32
    return %arg0, %c0_i32, %arg1 : i32, i32, i32
  }
  func.func @transform_1(%arg0: i32, %arg1: i32) -> (i32, i32) {
    %c0_i32 = arith.constant 0 : i32
    %c0_i32_0 = arith.constant 0 : i32
    %c0_i32_1 = arith.constant 0 : i32
    return %c0_i32, %c0_i32_0 : i32, i32
  }
  func.func @transform_2(%arg0: i32, %arg1: i32) -> (i32, i32) {
    %c0_i32 = arith.constant 0 : i32
    %c0_i32_0 = arith.constant 0 : i32
    %c0_i32_1 = arith.constant 0 : i32
    return %c0_i32, %c0_i32_0 : i32, i32
  }
  func.func @transform_3(%arg0: i32, %arg1: i32) -> (i32, i32, i32) {
    %c0_i32 = arith.constant 0 : i32
    %c0_i32_0 = arith.constant 0 : i32
    return %arg0, %c0_i32, %arg1 : i32, i32, i32
  }
}

</mosaic_0001>

<bundles_post_ra>
// kernel: conv_bn_relu_forward.2
= control target key start
LH: loop header
LB: loop body
LE: loop exit
PB: predicated region body
PF: predicated region fallthrough
CT: control target
= control target key end

     0   :  { %s555_s12 = smov 0   ;;  %s557_s13 = smov 0   ;;  %s598_s0 = inlined_call_operand.vmem [shape: bf16[2,36,256], index: 0, kind: input, shape index: {}]   ;;  %s599_s1 = inlined_call_operand.vmem [shape: bf16[8,36], index: 1, kind: input, shape index: {}]   ;;  %s600_s2 = inlined_call_operand.vmem [shape: bf16[2,8,256], index: 2, kind: output, shape index: {0}]   ;;  %s601_s3 = inlined_call_operand.vmem [shape: f32[2,8,2], index: 3, kind: output, shape index: {1}]  }
   0x1   :  { %s559_s14 = smov 0  }
   0x2 LB: > { %s26_s15 = sadd.s32 1, %s527_s13  ;;  %p456_p0 = scmp.ge.s32.totalorder %s531_s14, 1  ;;  %s531_s14 = sphi %s559_s14, %s14_s14   ;;  %s527_s13 = sphi %s557_s13, %s603_s13   ;;  %s523_s12 = sphi %s555_s12, %s602_s12  }
   0x3   : > { %p28_p1 = scmp.ge.s32.totalorder %s26_s15, 2  ;;  %p161_p2 = scmp.lt.s32.totalorder %s531_s14, 3 }
   0x5   : > { %s605_s15 = smov (%p28_p1, %s26_s15), 0  ;;  %p162_p3 = pnand %p456_p0, %p161_p2 }
   0x6   : > { %p198_p4 = scmp.lt.s32.totalorder (!%p162_p3), %s523_s12, 1 }
   0x7   : > { %165 = sbr.rel (%p162_p3) target bundleno = 374 (0x176), region = 28 }
   0xc   : > { %v533_v0 = vmov 0   ;;  %s607_s12 = smov (!%p198_p4, %s523_s12), 1  ;;  %vm257_vm0 = vcmask 1041408   ;;  %v222_v9 = vld [vmem:[%s599_s1] sm:$0xf]  ;;  %vm253_vm1 = vcmask 293888  }
   0xd   : > { %296 = vmatprep.mubr.bf16.mxu0 %v533_v0  ;;  %s474_s16 = smul.u32 40, %s607_s12  ;;  %s472_s22 = sshll.u32 %s607_s12, 3  ;;  %vm318_vm2 = vcmask 15360   ;;  %v534_v19 = vmov 0.0   ;;  %vm329_vm3 = vcmask 7168  }
   0xe   : > { %s215_s25 = scalar_lea.vmem %s600_s2, %s472_s22  ;;  %s220_s28 = scalar_lea.vmem %s601_s3, %s472_s22 }
   0xf   : > { %s205_s19 = scalar_lea.vmem %s598_s0, %s474_s16  ;;  %319 = vst.msk [vmem:[%s220_s28] sm:$0xff] %vm318_vm2, %v534_v19 }
  0x10   : > { %v227_v1 = vld [vmem:[%s205_s19 + $0x20] sm:$0x33]  ;;  %v503_v4 = vld [vmem:[%s205_s19 + $0x14] ss:$8 sps:$4 sm:$0xff]   ;;  %v505_v6 = vld [vmem:[%s205_s19 + $0x10] ss:$8 sps:$4 sm:$0xff]  }
  0x11   : > { %v466_v2 = vcombine.high %v227_v1, %v227_v1  ;;  %v465_v3 = vcombine.low %v227_v1, %v227_v1  ;;  %v506_v7 = vld [vmem:[%s205_s19 + $0x4] ss:$8 sps:$4 sm:$0xff]   ;;  %v508_v8 = vld [vmem:[%s205_s19] ss:$8 sps:$4 sm:$0xff]  }
  0x13   : > { %467 = vmatprep.subr.msk.bf16.mxu0 %vm257_vm0, %v466_v2  ;;  %v259_v5 = vsel %vm257_vm0, %v465_v3, 0 }
  0x14   : > { %275 = vmatpush1.bf16.msra.mxu0 %v259_v5 }
  0x15   : > { %276 = vmatprep.subr.bf16.mxu0 %v503_v4 }
  0x16   : > { %v328_v21 = vld [vmem:[%s220_s28] sm:$0xff] }
  0x18   : > { %277 = vmatpush1.bf16.msra.mxu0 %v505_v6 }
  0x19   : > { %278 = vmatprep.subr.bf16.mxu0 %v506_v7 }
  0x1c   : > { %279 = vmatpush1.bf16.msra.mxu0 %v508_v8 }
  0x1f   : > { %468 = vmatmul.mubr.msk.bf16.vlgmr.msra.gmra.mxu0 %vm253_vm1, %v222_v9 }
  0xdf   : > { %v298_v10 = vpop.f32.mrf.mxu0 }
  0xe0   : > { %v323_v16 = vmul.f32 %v298_v10, %v298_v10 }
  0xe1   : > { %v300_v11 = vpop.f32.mrf.mxu0 }
  0xe2   : > { %v473_v12 = vpack.c.bf16 %v300_v11, %v298_v10  ;;  %v320_v13 = vadd.f32 %v300_v11, %v298_v10  ;;  %v324_v14 = vmul.f32 %v300_v11, %v300_v11 }
  0xe3   : > { %v302_v15 = vpop.f32.mrf.mxu0 }
  0xe4   : > { %313 = vst [vmem:[%s215_s25] sm:$0xff] %v473_v12  ;;  %321 = vadd.xlane.f32.xlu0 %v320_v13  ;;  %v325_v18 = vadd.f32 %v324_v14, %v323_v16 }
  0xe5   : > { %v303_v17 = vpop.f32.mrf.mxu0 }
  0xe8   : > { %326 = vadd.xlane.f32.xlu0 %v325_v18 }
 0x16d   : > { %v322_v20 = vpop.xlane.xlu0 %321 }
 0x171   : > { %v327_v22 = vpop.xlane.xlu0 %326 }
 0x172   : > { %v330_v23 = vsel %vm329_vm3, %v322_v20, %v327_v22 }
 0x173   : > { %v331_v24 = vadd.f32 %v330_v23, %v328_v21 }
 0x175   : > { %333 = vst.msk [vmem:[%s220_s28] sm:$0xff] %vm318_vm2, %v331_v24 }
 0x176 PF: > { %s14_s14 = sadd.s32 1, %s531_s14   ;;  %s602_s12 = smov %s527_s13 }
 0x177   : > { %p11_p5 = scmp.ge.s32.totalorder %s14_s14, 4   ;;  %s603_s13 = smov %s605_s15 }
 0x179   :  { %13 = sbr.rel (!%p11_p5) target bundleno = 2 (0x2), region = 74 }

// kernel: conv_bn_relu_forward.3
= control target key start
LH: loop header
LB: loop body
LE: loop exit
PB: predicated region body
PF: predicated region fallthrough
CT: control target
= control target key end

     0   :  { %s408_s12 = smov 0   ;;  %s410_s13 = smov 0   ;;  %s447_s0 = inlined_call_operand.vmem [shape: bf16[2,8,256], index: 0, kind: input, shape index: {}]   ;;  %s448_s1 = inlined_call_operand.vmem [shape: f32[8,1], index: 1, kind: input, shape index: {}]   ;;  %s449_s2 = inlined_call_operand.vmem [shape: f32[8,1], index: 2, kind: input, shape index: {}]   ;;  %s450_s3 = inlined_call_operand.vmem [shape: f32[2,8,256], index: 3, kind: output, shape index: {}]  }
   0x1   :  { %s412_s14 = smov 0  }
   0x2 LB: > { %s25_s15 = sadd.s32 1, %s381_s13  ;;  %p328_p0 = scmp.ge.s32.totalorder %s385_s14, 1  ;;  %s385_s14 = sphi %s412_s14, %s13_s14   ;;  %s381_s13 = sphi %s410_s13, %s452_s13   ;;  %s377_s12 = sphi %s408_s12, %s451_s12  }
   0x3   : > { %p27_p1 = scmp.ge.s32.totalorder %s25_s15, 2  ;;  %p158_p2 = scmp.lt.s32.totalorder %s385_s14, 3 }
   0x5   : > { %s454_s15 = smov (%p27_p1, %s25_s15), 0  ;;  %p159_p3 = pnand %p328_p0, %p158_p2 }
   0x6   : > { %p191_p4 = scmp.lt.s32.totalorder (!%p159_p3), %s377_s12, 1 }
   0x7   : > { %162 = sbr.rel (%p159_p3) target bundleno = 148 (0x94), region = 32 }
   0xc   : > { %v213_v0 = vld [vmem:[%s448_s1] sm:$0xff]  ;;  %v387_v1 = vmov 0   ;;  %s456_s12 = smov (!%p191_p4, %s377_s12), 1 }
   0xd   : > { %362 = vset.pattern.permute.xlu0 %v387_v1  ;;  %v221_v2 = vld [vmem:[%s449_s2] sm:$0xff]  ;;  %s335_s20 = sshll.u32 %s456_s12, 3  ;;  %s336_s24 = sshll.u32 %s456_s12, 4 }
   0xe   : > { %216 = vperm.xlu0 %362, %v213_v0   ;;  %s198_s23 = scalar_lea.vmem %s447_s0, %s335_s20  ;;  %s208_s27 = scalar_lea.vmem %s450_s3, %s336_s24 }
   0xf   : > { %v210_v3 = vld [vmem:[%s198_s23] sm:$0xff] }
  0x10   : > { %v211_v4 = vunpack.c.l.bf16 %v210_v3  ;;  %v212_v5 = vunpack.c.h.bf16 %v210_v3 }
  0x12   : > { %224 = vperm.xlu0 %362, %v221_v2  }
  0x89   : > { %v217_v6 = vpop.permute.xlu0 %216 }
  0x8a   : > { %v219_v7 = vmul.f32 %v217_v6, %v211_v4  ;;  %v220_v8 = vmul.f32 %v217_v6, %v212_v5 }
  0x8d   : > { %v225_v9 = vpop.permute.xlu0 %224 }
  0x8e   : > { %v227_v10 = vadd.f32 %v225_v9, %v219_v7  ;;  %v228_v11 = vadd.f32 %v225_v9, %v220_v8 }
  0x90   : > { %vm229_vm0 = vcmp.gt.f32.partialorder %v227_v10, 0.0  ;;  %vm230_vm1 = vcmp.gt.f32.partialorder %v228_v11, 0.0  ;;  %v231_v12 = vmul.f32 0.0, %v227_v10  ;;  %v232_v13 = vmul.f32 0.0, %v228_v11 }
  0x92   : > { %v233_v14 = vsel %vm229_vm0, %v227_v10, %v231_v12  ;;  %v234_v15 = vsel %vm230_vm1, %v228_v11, %v232_v13 }
  0x93   : > { %235 = vst [vmem:[%s208_s27] sm:$0xff] %v233_v14  ;;  %236 = vst [vmem:[%s208_s27 + $0x8] sm:$0xff] %v234_v15 }
  0x94 PF: > { %s13_s14 = sadd.s32 1, %s385_s14   ;;  %s451_s12 = smov %s381_s13 }
  0x95   : > { %p10_p5 = scmp.ge.s32.totalorder %s13_s14, 4   ;;  %s452_s13 = smov %s454_s15 }
  0x97   :  { %12 = sbr.rel (!%p10_p5) target bundleno = 2 (0x2), region = 62 }

</bundles_post_ra>
